<compile_context>
chip_gen: v7x
topology: tpu7x:2x2x1
jax: 0.10.0
libtpu: 0.0.40
codegen_flags: <defaults>
</compile_context>

<pallas_src>
import math
from functools import partial

import jax
import jax.numpy as jnp
from jax.experimental import pallas as pl
from jax.experimental.pallas import tpu as pltpu


def _round_up(a, b):
    return ((a + b - 1) // b) * b


def _vmem_budget_bytes():
    """Usable scoped-VMEM budget for this kernel (headroom vs physical capacity)."""
    try:
        cap = int(getattr(pltpu.get_tpu_info(), "vmem_capacity_bytes",
                          64 * 1024 * 1024))
    except Exception:
        cap = 64 * 1024 * 1024                       # conservative (v7x-sized) fallback
    # ~48 MiB on v7x (64 MiB physical), ~96 MiB on v5e/v6e (128 MiB physical).
    return int(min(cap * 3 // 4, 100 * 1024 * 1024))


# ------------------------------------------------------------------------------------
# Kernels.  adj tiles arrive in their HBM dtype (typically f32) and are cast to the
# rhs compute dtype (bf16) in-kernel, right before the MXU dot (f32 accumulation).
# ------------------------------------------------------------------------------------

def _gcn_support_kernel(adj_ref, s_ref, b_ref, o_ref, acc_ref, *, tk, rhs_resident):
    """acc += bf16(adj_tile) @ support_tile ; at the last k step: out = acc + bias."""
    k = pl.program_id(1)

    @pl.when(k == 0)
    def _():
        acc_ref[...] = jnp.zeros_like(acc_ref)

    a = adj_ref[...].astype(s_ref.dtype)
    if rhs_resident:                      # resident support: slice the k tile in VMEM
        s = s_ref[pl.ds(pl.multiple_of(k * tk, tk), tk), :]
    else:                                 # streamed support: the ref view IS the tile
        s = s_ref[...]
    acc_ref[...] += jnp.dot(a, s, preferred_element_type=jnp.float32)

    @pl.when(k == pl.num_programs(1) - 1)
    def _():
        o_ref[...] = (acc_ref[...] + b_ref[...]).astype(o_ref.dtype)


def _gcn_reassoc_kernel(adj_ref, x_ref, w_ref, b_ref, o_ref, acc_ref, *, tk,
                        rhs_resident):
    """acc += bf16(adj_tile) @ x_tile ; at the last k step: out = bf16(acc) @ W + b."""
    k = pl.program_id(1)

    @pl.when(k == 0)
    def _():
        acc_ref[...] = jnp.zeros_like(acc_ref)

    a = adj_ref[...].astype(x_ref.dtype)
    if rhs_resident:
        xt = x_ref[pl.ds(pl.multiple_of(k * tk, tk), tk), :]
    else:
        xt = x_ref[...]
    acc_ref[...] += jnp.dot(a, xt, preferred_element_type=jnp.float32)

    @pl.when(k == pl.num_programs(1) - 1)
    def _():
        out = jnp.dot(acc_ref[...].astype(w_ref.dtype), w_ref[...],
                      preferred_element_type=jnp.float32)
        o_ref[...] = (out + b_ref[...]).astype(o_ref.dtype)


# ------------------------------------------------------------------------------------
# Wrapper
# ------------------------------------------------------------------------------------

def graph_convolution(x, adj, weight, bias=None, *,
                      compute_dtype=jnp.bfloat16, tile=512):
    """Pallas GCN layer: adj @ (x @ weight) + bias  ->  [N, F_out] float32.

    x: [N, F_in]   adj: [N, N] (dense)   weight: [F_in, F_out]   bias: [F_out] | None
    """
    N, F_in = x.shape
    assert weight.shape[0] == F_in
    F_out = weight.shape[1]

    c_it = jnp.dtype(compute_dtype).itemsize
    a_it = adj.dtype.itemsize
    f_in_p = _round_up(F_in, 128)
    f_out_p = _round_up(F_out, 128)

    # Path choice by lane-padded contraction width: reassociate to (adj @ x) @ W only
    # when padded F_in is strictly narrower than padded F_out.
    reassoc = f_in_p < f_out_p
    rhs_cols = f_in_p if reassoc else f_out_p
    acc_cols = rhs_cols
    w_bytes = f_in_p * f_out_p * c_it if reassoc else 0

    budget = _vmem_budget_bytes()

    # ---- tile selection --------------------------------------------------------------
    if N <= 512:
        # One full-dim block: no (8,128) constraint, no adjacency padding at all.
        tm = tk = N
        n_pad = N
    else:
        tm = tile
        while tm > 128:
            need = (2 * tm * tm * a_it               # adj tiles (double-buffered)
                    + 2 * tm * rhs_cols * c_it       # streamed rhs tiles
                    + 2 * tm * f_out_p * 4           # output tiles
                    + tm * acc_cols * 4              # accumulator
                    + w_bytes + 2 * f_out_p * 4)
            if need <= budget:
                break
            tm //= 2
        # Prefer a slightly smaller tile if that avoids a padded HBM copy of adj.
        for cand in (tm, tm // 2, tm // 4):
            if cand >= 128 and N % cand == 0:
                tm = cand
                break
        tk = tm
        n_pad = _round_up(N, tm)

    # ---- operands ---------------------------------------------------------------------
    # adj stays in its HBM dtype (no wrapper-side cast pass); pad only if unaligned.
    adj_in = adj if n_pad == N else jnp.pad(adj, ((0, n_pad - N), (0, n_pad - N)))

    b_p = jnp.zeros((1, f_out_p), jnp.float32)
    if bias is not None:
        b_p = b_p.at[0, :F_out].set(bias.astype(jnp.float32))

    if reassoc:
        # (adj @ x) @ W: cheap inner dim, W applied once per row tile in the epilogue.
        rhs = jnp.pad(x.astype(compute_dtype),
                      ((0, n_pad - N), (0, f_in_p - F_in)))
        w_p = jnp.pad(weight, ((0, f_in_p - F_in), (0, f_out_p - F_out))
                      ).astype(compute_dtype)
    else:
        # adj @ (x @ W): support computed exactly once, outside the N^2 loop.
        support = jnp.dot(x.astype(jnp.float32), weight.astype(jnp.float32))
        rhs = jnp.pad(support, ((0, n_pad - N), (0, f_out_p - F_out))
                      ).astype(compute_dtype)
        w_p = None

    # rhs residency: keep the whole x/support in VMEM when it fits so it is read from
    # HBM once instead of once per row tile.
    base_need = (2 * tm * tk * a_it + 2 * tm * f_out_p * 4 + tm * acc_cols * 4
                 + w_bytes + 2 * f_out_p * 4)
    rhs_resident = (base_need + n_pad * rhs_cols * c_it) <= budget
    rhs_buf = n_pad * rhs_cols * c_it if rhs_resident else 2 * tk * rhs_cols * c_it
    vmem_limit = int(min(budget, max(2 * (base_need + rhs_buf), 16 * 1024 * 1024)))

    grid = (n_pad // tm, n_pad // tk)
    n_row_tiles = grid[0]

    # ---- cost estimate (actual HBM traffic, incl. rhs re-streaming factor) -------------
    rhs_reads = 1 if rhs_resident else n_row_tiles
    bytes_accessed = (n_pad * n_pad * a_it
                      + rhs_reads * n_pad * rhs_cols * c_it
                      + w_bytes + f_out_p * 4
                      + n_pad * f_out_p * 4)
    flops = 2 * n_pad * n_pad * rhs_cols
    if reassoc:
        flops += 2 * n_pad * f_in_p * f_out_p
    cost = pl.CostEstimate(flops=int(flops), transcendentals=0,
                           bytes_accessed=int(bytes_accessed))

    def _run(single_buffer_invariants):
        def inv_spec(shape):
            if single_buffer_invariants:
                return pl.BlockSpec(shape, lambda i, k: (0, 0),
                                    pipeline_mode=pl.Buffered(1))
            return pl.BlockSpec(shape, lambda i, k: (0, 0))

        adj_spec = pl.BlockSpec((tm, tk), lambda i, k: (i, k))
        if rhs_resident:
            rhs_spec = inv_spec((n_pad, rhs_cols))
        else:
            rhs_spec = pl.BlockSpec((tk, rhs_cols), lambda i, k: (k, 0))
        b_spec = inv_spec((1, f_out_p))

        if reassoc:
            kernel = partial(_gcn_reassoc_kernel, tk=tk, rhs_resident=rhs_resident)
            in_specs = [adj_spec, rhs_spec, inv_spec((f_in_p, f_out_p)), b_spec]
            operands = (adj_in, rhs, w_p, b_p)
        else:
            kernel = partial(_gcn_support_kernel, tk=tk, rhs_resident=rhs_resident)
            in_specs = [adj_spec, rhs_spec, b_spec]
            operands = (adj_in, rhs, b_p)

        return pl.pallas_call(
            kernel,
            out_shape=jax.ShapeDtypeStruct((n_pad, f_out_p), jnp.float32),
            grid_spec=pltpu.PrefetchScalarGridSpec(
                num_scalar_prefetch=0,
                grid=grid,
                in_specs=in_specs,
                out_specs=pl.BlockSpec((tm, f_out_p), lambda i, k: (i, 0)),
                scratch_shapes=[pltpu.VMEM((tm, acc_cols), jnp.float32)],
            ),
            compiler_params=pltpu.CompilerParams(
                dimension_semantics=("parallel", "arbitrary"),
                vmem_limit_bytes=vmem_limit,
            ),
            cost_estimate=cost,
        )(*operands)

    # Note: on v7x (2 TensorCores) with a single row tile a parallel F_out grid axis
    # would keep the second core busy; omitted since the dominant regime is large N.
    try:
        out_p = _run(single_buffer_invariants=True)
    except Exception:
        # Fallback for jax versions where pl.Buffered(1) is not accepted on the
        # top-level pallas_call pipeline; identical math, default double-buffering.
        out_p = _run(single_buffer_invariants=False)

    return out_p[:N, :F_out]


if __name__ == "__main__":
    # Small, deterministic setup consistent with the module's __init__/forward.
    N = 16
    in_features = 8
    out_features = 32

    key = jax.random.PRNGKey(0)
    k_x, k_adj, k_w, k_b = jax.random.split(key, 4)

    f32 = jnp.float32
    bf = lambda a: a.astype(jnp.bfloat16).astype(f32)

    x = jax.random.normal(k_x, (N, in_features), dtype=f32)

    # Dense "adjacency": sparse-ish nonnegative matrix, self loops, row-normalized.
    adj_raw = jax.random.uniform(k_adj, (N, N), dtype=f32)
    adj = jnp.where(adj_raw > 0.7, adj_raw, 0.0)
    adj = adj + jnp.eye(N, dtype=f32)
    adj = adj / jnp.sum(adj, axis=1, keepdims=True)

    # reset_parameters(): uniform(-stdv, stdv), stdv = 1/sqrt(out_features)
    stdv = 1.0 / math.sqrt(out_features)
    weight = jax.random.uniform(k_w, (in_features, out_features), dtype=f32,
                                minval=-stdv, maxval=stdv)
    bias = jax.random.uniform(k_b, (out_features,), dtype=f32,
                              minval=-stdv, maxval=stdv)

    out = jax.block_until_ready(graph_convolution(x, adj, weight, bias))
    assert out.shape == (N, out_features)

    # Tight check vs a reference with the same bf16 boundary casts (support path).
    ref_bf = bf(adj) @ bf(x @ weight) + bias[None, :]
    assert jnp.allclose(out, ref_bf, atol=5e-3, rtol=5e-3), "mismatch vs bf16 reference"
    # Loose check vs full-f32 module semantics: adj @ (x @ W) + b.
    ref = adj @ (x @ weight) + bias[None, :]
    assert jnp.allclose(out, ref, atol=5e-2, rtol=5e-2), "mismatch vs f32 reference"

    # Also exercise F_in > F_out (still the support path after lane padding).
    x2 = jax.random.normal(k_x, (N, out_features), dtype=f32)
    stdv2 = 1.0 / math.sqrt(in_features)
    w2 = jax.random.uniform(k_w, (out_features, in_features), dtype=f32,
                            minval=-stdv2, maxval=stdv2)
    b2 = jax.random.uniform(k_b, (in_features,), dtype=f32,
                            minval=-stdv2, maxval=stdv2)
    out2 = jax.block_until_ready(graph_convolution(x2, adj, w2, b2))
    ref2 = bf(adj) @ bf(x2 @ w2) + b2[None, :]
    assert out2.shape == (N, in_features)
    assert jnp.allclose(out2, ref2, atol=5e-3, rtol=5e-3), "mismatch (support path)"

    # Wide output -> reassociated path ((adj @ x) @ W with bf16 MXU epilogue).
    wide = 256
    stdv3 = 1.0 / math.sqrt(wide)
    w3 = jax.random.uniform(k_w, (in_features, wide), dtype=f32,
                            minval=-stdv3, maxval=stdv3)
    b3 = jax.random.uniform(k_b, (wide,), dtype=f32, minval=-stdv3, maxval=stdv3)
    out3 = jax.block_until_ready(graph_convolution(x, adj, w3, b3))
    acc_emu = bf(adj) @ bf(x)
    ref3 = bf(acc_emu) @ bf(w3) + b3[None, :]
    assert out3.shape == (N, wide)
    assert jnp.allclose(out3, ref3, atol=1e-2, rtol=1e-2), "mismatch (reassoc path)"
    assert jnp.allclose(out3, adj @ (x @ w3) + b3[None, :], atol=5e-2, rtol=5e-2), \
        "mismatch vs f32 reference (reassoc path)"

    print("KERNEL_OK")
</pallas_src>

<mosaic_0001>
module attributes {stable_mosaic.version = 11 : i64} {
  func.func @_gcn_support_kernel(%arg0: i32, %arg1: i32, %arg2: memref<16x16xf32, #tpu.memory_space<vmem>>, %arg3: memref<16x128xbf16, #tpu.memory_space<vmem>>, %arg4: memref<1x128xf32, #tpu.memory_space<vmem>>, %arg5: memref<16x128xf32, #tpu.memory_space<vmem>>, %arg6: memref<16x128xf32, #tpu.memory_space<vmem>>) attributes {dimension_semantics = [#tpu.dimension_semantics<parallel>, #tpu.dimension_semantics<arbitrary>], iteration_bounds = array<i64: 1, 1>, scalar_prefetch = 0 : i64, scratch_operands = 1 : i64, tpu.core_type = #tpu.core_type<tc>, window_params = [{transform_indices = @transform_0, window_bounds = array<i64: 16, 16>}, {pipeline_mode = #tpu.pipeline_mode<synchronous>, transform_indices = @transform_1, window_bounds = array<i64: 16, 128>}, {pipeline_mode = #tpu.pipeline_mode<synchronous>, transform_indices = @transform_2, window_bounds = array<i64: 1, 128>}, {transform_indices = @transform_3, window_bounds = array<i64: 16, 128>}]} {
    %c0_i32 = arith.constant 0 : i32
    %0 = arith.cmpi eq, %arg1, %c0_i32 : i32
    %1 = arith.extui %0 : i1 to i32
    %c0_i32_0 = arith.constant 0 : i32
    %2 = arith.cmpi ne, %1, %c0_i32_0 : i32
    scf.if %2 {
      %cst_9 = arith.constant 0.000000e+00 : f32
      %16 = vector.broadcast %cst_9 : f32 to vector<16x128xf32>
      %c0_10 = arith.constant 0 : index
      %c0_11 = arith.constant 0 : index
      %17 = vector.load %arg6[%c0_10, %c0_11] : memref<16x128xf32, #tpu.memory_space<vmem>>, vector<16x128xf32>
      tpu.vector_store %arg6[%c0_10, %c0_11], %16 {strides = array<i32>} : memref<16x128xf32, #tpu.memory_space<vmem>>, vector<16x128xf32>,
    } else {
    }
    %c0 = arith.constant 0 : index
    %c0_1 = arith.constant 0 : index
    %3 = vector.load %arg2[%c0, %c0_1] : memref<16x16xf32, #tpu.memory_space<vmem>>, vector<16x16xf32>
    %4 = arith.truncf %3 : vector<16x16xf32> to vector<16x16xbf16>
    %c16_i32 = arith.constant 16 : i32
    %5 = arith.muli %arg1, %c16_i32 : i32
    %6 = tpu.assume_multiple %5, 16 : i32
    %7 = arith.index_cast %6 : i32 to index
    %c0_2 = arith.constant 0 : index
    %8 = vector.load %arg3[%7, %c0_2] : memref<16x128xbf16, #tpu.memory_space<vmem>>, vector<16x128xbf16>
    %c0_3 = arith.constant 0 : index
    %c0_4 = arith.constant 0 : index
    %9 = vector.load %arg6[%c0_3, %c0_4] : memref<16x128xf32, #tpu.memory_space<vmem>>, vector<16x128xf32>
    %cst = arith.constant dense<0.000000e+00> : vector<16x128xf32>
    %10 = tpu.matmul %4, %8, %cst {dimension_numbers = #tpu.dot_dimension_numbers<[1], [0], [0], [1], [0, 0, 1, 1], [], []>} : vector<16x16xbf16>, vector<16x128xbf16>, vector<16x128xf32> -> vector<16x128xf32>
    %11 = arith.addf %9, %10 : vector<16x128xf32>
    %c0_5 = arith.constant 0 : index
    %c0_6 = arith.constant 0 : index
    %12 = vector.load %arg6[%c0_5, %c0_6] : memref<16x128xf32, #tpu.memory_space<vmem>>, vector<16x128xf32>
    tpu.vector_store %arg6[%c0_5, %c0_6], %11 {strides = array<i32>} : memref<16x128xf32, #tpu.memory_space<vmem>>, vector<16x128xf32>,
    %c0_i32_7 = arith.constant 0 : i32
    %13 = arith.cmpi eq, %arg1, %c0_i32_7 : i32
    %14 = arith.extui %13 : i1 to i32
    %c0_i32_8 = arith.constant 0 : i32
    %15 = arith.cmpi ne, %14, %c0_i32_8 : i32
    scf.if %15 {
      %c0_9 = arith.constant 0 : index
      %c0_10 = arith.constant 0 : index
      %16 = vector.load %arg6[%c0_9, %c0_10] : memref<16x128xf32, #tpu.memory_space<vmem>>, vector<16x128xf32>
      %c0_11 = arith.constant 0 : index
      %c0_12 = arith.constant 0 : index
      %17 = vector.load %arg4[%c0_11, %c0_12] : memref<1x128xf32, #tpu.memory_space<vmem>>, vector<1x128xf32>
      %18 = vector.broadcast %17 : vector<1x128xf32> to vector<16x128xf32>
      %19 = arith.addf %16, %18 : vector<16x128xf32>
      %c0_13 = arith.constant 0 : index
      %c0_14 = arith.constant 0 : index
      %20 = vector.load %arg5[%c0_13, %c0_14] : memref<16x128xf32, #tpu.memory_space<vmem>>, vector<16x128xf32>
      tpu.vector_store %arg5[%c0_13, %c0_14], %19 {strides = array<i32>} : memref<16x128xf32, #tpu.memory_space<vmem>>, vector<16x128xf32>,
    } else {
    }
    return
  }
  func.func @transform_0(%arg0: i32, %arg1: i32) -> (i32, i32) {
    %c0_i32 = arith.constant 0 : i32
    return %arg0, %arg1 : i32, i32
  }
  func.func @transform_1(%arg0: i32, %arg1: i32) -> (i32, i32) {
    %c0_i32 = arith.constant 0 : i32
    %c0_i32_0 = arith.constant 0 : i32
    %c0_i32_1 = arith.constant 0 : i32
    return %c0_i32, %c0_i32_0 : i32, i32
  }
  func.func @transform_2(%arg0: i32, %arg1: i32) -> (i32, i32) {
    %c0_i32 = arith.constant 0 : i32
    %c0_i32_0 = arith.constant 0 : i32
    %c0_i32_1 = arith.constant 0 : i32
    return %c0_i32, %c0_i32_0 : i32, i32
  }
  func.func @transform_3(%arg0: i32, %arg1: i32) -> (i32, i32) {
    %c0_i32 = arith.constant 0 : i32
    %c0_i32_0 = arith.constant 0 : i32
    return %arg0, %c0_i32 : i32, i32
  }
}

module attributes {stable_mosaic.version = 11 : i64} {
  func.func @_gcn_support_kernel(%arg0: i32, %arg1: i32, %arg2: memref<16x16xf32, #tpu.memory_space<vmem>>, %arg3: memref<16x128xbf16, #tpu.memory_space<vmem>>, %arg4: memref<1x128xf32, #tpu.memory_space<vmem>>, %arg5: memref<16x128xf32, #tpu.memory_space<vmem>>, %arg6: memref<16x128xf32, #tpu.memory_space<vmem>>) attributes {dimension_semantics = [#tpu.dimension_semantics<parallel>, #tpu.dimension_semantics<arbitrary>], iteration_bounds = array<i64: 1, 1>, scalar_prefetch = 0 : i64, scratch_operands = 1 : i64, tpu.core_type = #tpu.core_type<tc>, window_params = [{transform_indices = @transform_0, window_bounds = array<i64: 16, 16>}, {pipeline_mode = #tpu.pipeline_mode<synchronous>, transform_indices = @transform_1, window_bounds = array<i64: 16, 128>}, {pipeline_mode = #tpu.pipeline_mode<synchronous>, transform_indices = @transform_2, window_bounds = array<i64: 1, 128>}, {transform_indices = @transform_3, window_bounds = array<i64: 16, 128>}]} {
    %c0_i32 = arith.constant 0 : i32
    %0 = arith.cmpi eq, %arg1, %c0_i32 : i32
    %1 = arith.extui %0 : i1 to i32
    %c0_i32_0 = arith.constant 0 : i32
    %2 = arith.cmpi ne, %1, %c0_i32_0 : i32
    scf.if %2 {
      %cst_9 = arith.constant 0.000000e+00 : f32
      %16 = vector.broadcast %cst_9 : f32 to vector<16x128xf32>
      %c0_10 = arith.constant 0 : index
      %c0_11 = arith.constant 0 : index
      %17 = vector.load %arg6[%c0_10, %c0_11] : memref<16x128xf32, #tpu.memory_space<vmem>>, vector<16x128xf32>
      tpu.vector_store %arg6[%c0_10, %c0_11], %16 {strides = array<i32>} : memref<16x128xf32, #tpu.memory_space<vmem>>, vector<16x128xf32>,
    } else {
    }
    %c0 = arith.constant 0 : index
    %c0_1 = arith.constant 0 : index
    %3 = vector.load %arg2[%c0, %c0_1] : memref<16x16xf32, #tpu.memory_space<vmem>>, vector<16x16xf32>
    %4 = arith.truncf %3 : vector<16x16xf32> to vector<16x16xbf16>
    %c16_i32 = arith.constant 16 : i32
    %5 = arith.muli %arg1, %c16_i32 : i32
    %6 = tpu.assume_multiple %5, 16 : i32
    %7 = arith.index_cast %6 : i32 to index
    %c0_2 = arith.constant 0 : index
    %8 = vector.load %arg3[%7, %c0_2] : memref<16x128xbf16, #tpu.memory_space<vmem>>, vector<16x128xbf16>
    %c0_3 = arith.constant 0 : index
    %c0_4 = arith.constant 0 : index
    %9 = vector.load %arg6[%c0_3, %c0_4] : memref<16x128xf32, #tpu.memory_space<vmem>>, vector<16x128xf32>
    %cst = arith.constant dense<0.000000e+00> : vector<16x128xf32>
    %10 = tpu.matmul %4, %8, %cst {dimension_numbers = #tpu.dot_dimension_numbers<[1], [0], [0], [1], [0, 0, 1, 1], [], []>} : vector<16x16xbf16>, vector<16x128xbf16>, vector<16x128xf32> -> vector<16x128xf32>
    %11 = arith.addf %9, %10 : vector<16x128xf32>
    %c0_5 = arith.constant 0 : index
    %c0_6 = arith.constant 0 : index
    %12 = vector.load %arg6[%c0_5, %c0_6] : memref<16x128xf32, #tpu.memory_space<vmem>>, vector<16x128xf32>
    tpu.vector_store %arg6[%c0_5, %c0_6], %11 {strides = array<i32>} : memref<16x128xf32, #tpu.memory_space<vmem>>, vector<16x128xf32>,
    %c0_i32_7 = arith.constant 0 : i32
    %13 = arith.cmpi eq, %arg1, %c0_i32_7 : i32
    %14 = arith.extui %13 : i1 to i32
    %c0_i32_8 = arith.constant 0 : i32
    %15 = arith.cmpi ne, %14, %c0_i32_8 : i32
    scf.if %15 {
      %c0_9 = arith.constant 0 : index
      %c0_10 = arith.constant 0 : index
      %16 = vector.load %arg6[%c0_9, %c0_10] : memref<16x128xf32, #tpu.memory_space<vmem>>, vector<16x128xf32>
      %c0_11 = arith.constant 0 : index
      %c0_12 = arith.constant 0 : index
      %17 = vector.load %arg4[%c0_11, %c0_12] : memref<1x128xf32, #tpu.memory_space<vmem>>, vector<1x128xf32>
      %18 = vector.broadcast %17 : vector<1x128xf32> to vector<16x128xf32>
      %19 = arith.addf %16, %18 : vector<16x128xf32>
      %c0_13 = arith.constant 0 : index
      %c0_14 = arith.constant 0 : index
      %20 = vector.load %arg5[%c0_13, %c0_14] : memref<16x128xf32, #tpu.memory_space<vmem>>, vector<16x128xf32>
      tpu.vector_store %arg5[%c0_13, %c0_14], %19 {strides = array<i32>} : memref<16x128xf32, #tpu.memory_space<vmem>>, vector<16x128xf32>,
    } else {
    }
    return
  }
  func.func @transform_0(%arg0: i32, %arg1: i32) -> (i32, i32) {
    %c0_i32 = arith.constant 0 : i32
    return %arg0, %arg1 : i32, i32
  }
  func.func @transform_1(%arg0: i32, %arg1: i32) -> (i32, i32) {
    %c0_i32 = arith.constant 0 : i32
    %c0_i32_0 = arith.constant 0 : i32
    %c0_i32_1 = arith.constant 0 : i32
    return %c0_i32, %c0_i32_0 : i32, i32
  }
  func.func @transform_2(%arg0: i32, %arg1: i32) -> (i32, i32) {
    %c0_i32 = arith.constant 0 : i32
    %c0_i32_0 = arith.constant 0 : i32
    %c0_i32_1 = arith.constant 0 : i32
    return %c0_i32, %c0_i32_0 : i32, i32
  }
  func.func @transform_3(%arg0: i32, %arg1: i32) -> (i32, i32) {
    %c0_i32 = arith.constant 0 : i32
    %c0_i32_0 = arith.constant 0 : i32
    return %arg0, %c0_i32 : i32, i32
  }
}

</mosaic_0001>

<bundles_post_ra>
// kernel: tpu_custom_call.1
= control target key start
LH: loop header
LB: loop body
LE: loop exit
PB: predicated region body
PF: predicated region fallthrough
CT: control target
= control target key end

     0   :  { %8 = vsyncpa [#allocation4], 0  ;;  %s320_s0 = inlined_call_operand.hbm [shape: f32[16,16], index: 0, kind: input, shape index: {}]   ;;  %s321_s1 = inlined_call_operand.hbm [shape: bf16[16,128], index: 1, kind: input, shape index: {}]   ;;  %s322_s2 = inlined_call_operand.vmem [shape: f32[1,128], index: 2, kind: input, shape index: {}]   ;;  %s323_s3 = inlined_call_operand.hbm [shape: f32[16,128], index: 3, kind: output, shape index: {}]  }
   0x1   :  { %9 = vsyncpa [#allocation7], 0 }
   0x2   :  { %10 = vsyncpa [#allocation5], 0  ;;  %s246_s12 = smov [#allocation3]   ;;  %s174_s16 = scalar_lea.hbm %s320_s0, 256 }
   0x3   :  { %s16_s13 = sshll.u32 %s246_s12, 4  ;;  %p175_p0 = scmp.ne.s32.totalorder %s320_s0, %s174_s16  ;;  %s17_s13 = int_to_ptr.vmem [resolvable:$true] %s16_s13 }
   0x4   :  { %p178_p1 = scmp.lt.u32.totalorder %s174_s16, %s320_s0 }
   0x6   :  { %p180_p2 = pnand %p178_p1, %p175_p0 }
   0x8   :  { %183 = shalt.err (!%p180_p2)
}
   0x9   :  { %s184_s21 = scalar_lea.vmem %s17_s13, 256  ;;  %p189_p4 = scmp.lt.s32.totalorder %s17_s13, %s17_s13 }
   0xa   :  { %p185_p3 = scmp.ne.s32.totalorder %s17_s13, %s184_s21  ;;  %p190_p5 = scmp.lt.s32.totalorder %s184_s21, %s184_s21 }
   0xc   :  { %p191_p6 = por %p190_p5, %p189_p4 }
   0xe   :  { %p192_p7 = pnand %p191_p6, %p185_p3 }
  0x10   :  { %195 = shalt.err (!%p192_p7)
}
  0x11   :  { %s247_s22 = smov 128   ;;  %s248_s23 = smov 8  }
  0x12   :  { %22 = dma.hbm_to_vmem [thread:$0]  %s320_s0, 256, %s17_s13, [#allocation4], %s247_s22, %s247_s22, %s248_s23  }
  0x13   :  { %s249_s26 = smov [#allocation6]   ;;  %s196_s30 = scalar_lea.hbm %s321_s1, 128 }
  0x14   :  { %s28_s27 = sshll.u32 %s249_s26, 4  ;;  %p197_p8 = scmp.ne.s32.totalorder %s321_s1, %s196_s30  ;;  %s29_s27 = int_to_ptr.vmem [resolvable:$true] %s28_s27 }
  0x15   :  { %p200_p9 = scmp.lt.u32.totalorder %s196_s30, %s321_s1 }
  0x17   :  { %p202_p10 = pnand %p200_p9, %p197_p8 }
  0x19   :  { %205 = shalt.err (!%p202_p10)
}
  0x1a   :  { %s206_s8 = scalar_lea.vmem %s29_s27, 128  ;;  %p211_p12 = scmp.lt.s32.totalorder %s29_s27, %s29_s27 }
  0x1b   :  { %p207_p11 = scmp.ne.s32.totalorder %s29_s27, %s206_s8  ;;  %p212_p13 = scmp.lt.s32.totalorder %s206_s8, %s206_s8 }
  0x1d   :  { %p213_p0 = por %p212_p13, %p211_p12 }
  0x1f   :  { %p214_p1 = pnand %p213_p0, %p207_p11 }
  0x21   :  { %217 = shalt.err (!%p214_p1)
}
  0x22   :  { %s250_s0 = smov 64   ;;  %s251_s9 = smov 4  }
  0x23   :  { %34 = dma.hbm_to_vmem [thread:$0]  %s321_s1, 128, %s29_s27, [#allocation7], %s250_s0, %s250_s0, %s251_s9  }
  0x24   :  { %240 = dma.done.wait [#allocation4], 256  }
  0x25   :  { %241 = vsyncadd [#allocation4], 4294967040 }
  0x26   :  { %242 = dma.done.wait [#allocation7], 128  }
  0x27   :  { %243 = vsyncadd [#allocation7], 4294967168  ;;  %v252_v0 = vmov 0.0   ;;  %vm253_vm0 = vmmov 0   ;;  %v173_v1 = vld [vmem:[#allocation6] sm:$0xff]   ;;  %v50_v2 = vld [vmem:[#allocation3] sm:$0xff] }
  0x28   :  { %158 = vmatprep.subr.bf16.mxu0 %v252_v0  ;;  %160 = vmatprep.mubr.msk.bf16.mxu0 %vm253_vm0, %v252_v0  ;;  %v51_v3 = vld [vmem:[#allocation3 + $0x8] sm:$0xff]  ;;  %vm68_vm1 = vcmask 130048   ;;  %v155_v5 = vld [vmem:[%s322_s2] ss:$0 sm:$0xff]  ;;  %s254_s1 = smov [#allocation8]  }
  0x29   :  { %159 = vmatpush3.bf16.msra.mxu0 %v173_v1  ;;  %v52_v4 = vpack.c.bf16 %v51_v3, %v50_v2  ;;  %s138_s14 = sshll.u32 %s254_s1, 4  ;;  %s139_s14 = int_to_ptr.vmem [resolvable:$true] %s138_s14 }
  0x2a   :  { %s218_s15 = scalar_lea.vmem %s139_s14, 256  ;;  %p223_p3 = scmp.lt.s32.totalorder %s139_s14, %s139_s14 }
  0x2b   :  { %p219_p2 = scmp.ne.s32.totalorder %s139_s14, %s218_s15  ;;  %p224_p4 = scmp.lt.s32.totalorder %s218_s15, %s218_s15 }
  0x2c   :  { %161 = vmatmul.mubr.msk.bf16.vlgmr.msra.gmra.mrb[0].mxu0 %vm68_vm1, %v52_v4 }
  0x2d   :  { %p225_p5 = por %p224_p4, %p223_p3 }
  0x2f   :  { %p226_p6 = pnand %p225_p5, %p219_p2 }
  0xff   :  { %v106_v6 = vpop.f32.mrb[0].mxu0 }
 0x100   :  { %v129_v7 = vadd.f32 %v155_v5, %v106_v6  ;;  %v162_v8 = vpop.f32.mrb[1].mxu0 }
 0x101   :  { %v109_v9 = vpop.f32.mrb[2].mxu0 }
 0x102   :  { %131 = vst [vmem:[#allocation8] sm:$0xff] %v129_v7  ;;  %v130_v10 = vadd.f32 %v155_v5, %v109_v9  ;;  %v163_v11 = vpop.f32.mrb[3].mxu0 }
 0x104   :  { %132 = vst [vmem:[#allocation8 + $0x8] sm:$0xff] %v130_v10 }
 0x105   :  { %229 = shalt.err (!%p226_p6)
}
 0x106   :  { %s230_s17 = scalar_lea.hbm %s323_s3, 256 }
 0x107   :  { %p231_p7 = scmp.ne.s32.totalorder %s323_s3, %s230_s17  ;;  %p234_p8 = scmp.lt.u32.totalorder %s230_s17, %s323_s3 }
 0x109   :  { %p236_p9 = pnand %p234_p8, %p231_p7 }
 0x10b   :  { %239 = shalt.err (!%p236_p9)
}
 0x10c   :  { %144 = dma.vmem_to_hbm [thread:$0]  %s139_s14, 256, %s323_s3, [#allocation5], %s247_s22, %s247_s22, %s248_s23  }
 0x10d   :  { %244 = dma.done.wait [#allocation5], 256  }
 0x10e   :  { %245 = vsyncadd [#allocation5], 4294967040 }
 0x10f   :  { %148 = vsyncpa [#allocation4], 1 }
 0x110   :  { %149 = vsyncpa [#allocation7], 1 }
 0x111   :  { %150 = vsyncpa [#allocation5], 1 }

// kernel: tpu_custom_call.1
= control target key start
LH: loop header
LB: loop body
LE: loop exit
PB: predicated region body
PF: predicated region fallthrough
CT: control target
= control target key end

     0   :  { %8 = vsyncpa [#allocation4], 0  ;;  %s320_s0 = inlined_call_operand.hbm [shape: f32[16,16], index: 0, kind: input, shape index: {}]   ;;  %s321_s1 = inlined_call_operand.hbm [shape: bf16[16,128], index: 1, kind: input, shape index: {}]   ;;  %s322_s2 = inlined_call_operand.vmem [shape: f32[1,128], index: 2, kind: input, shape index: {}]   ;;  %s323_s3 = inlined_call_operand.hbm [shape: f32[16,128], index: 3, kind: output, shape index: {}]  }
   0x1   :  { %9 = vsyncpa [#allocation7], 0 }
   0x2   :  { %10 = vsyncpa [#allocation5], 0  ;;  %s246_s12 = smov [#allocation3]   ;;  %s174_s16 = scalar_lea.hbm %s320_s0, 256 }
   0x3   :  { %s16_s13 = sshll.u32 %s246_s12, 4  ;;  %p175_p0 = scmp.ne.s32.totalorder %s320_s0, %s174_s16  ;;  %s17_s13 = int_to_ptr.vmem [resolvable:$true] %s16_s13 }
   0x4   :  { %p178_p1 = scmp.lt.u32.totalorder %s174_s16, %s320_s0 }
   0x6   :  { %p180_p2 = pnand %p178_p1, %p175_p0 }
   0x8   :  { %183 = shalt.err (!%p180_p2)
}
   0x9   :  { %s184_s21 = scalar_lea.vmem %s17_s13, 256  ;;  %p189_p4 = scmp.lt.s32.totalorder %s17_s13, %s17_s13 }
   0xa   :  { %p185_p3 = scmp.ne.s32.totalorder %s17_s13, %s184_s21  ;;  %p190_p5 = scmp.lt.s32.totalorder %s184_s21, %s184_s21 }
   0xc   :  { %p191_p6 = por %p190_p5, %p189_p4 }
   0xe   :  { %p192_p7 = pnand %p191_p6, %p185_p3 }
  0x10   :  { %195 = shalt.err (!%p192_p7)
}
  0x11   :  { %s247_s22 = smov 128   ;;  %s248_s23 = smov 8  }
  0x12   :  { %22 = dma.hbm_to_vmem [thread:$0]  %s320_s0, 256, %s17_s13, [#allocation4], %s247_s22, %s247_s22, %s248_s23  }
  0x13   :  { %s249_s26 = smov [#allocation6]   ;;  %s196_s30 = scalar_lea.hbm %s321_s1, 128 }
  0x14   :  { %s28_s27 = sshll.u32 %s249_s26, 4  ;;  %p197_p8 = scmp.ne.s32.totalorder %s321_s1, %s196_s30  ;;  %s29_s27 = int_to_ptr.vmem [resolvable:$true] %s28_s27 }
  0x15   :  { %p200_p9 = scmp.lt.u32.totalorder %s196_s30, %s321_s1 }
  0x17   :  { %p202_p10 = pnand %p200_p9, %p197_p8 }
  0x19   :  { %205 = shalt.err (!%p202_p10)
}
  0x1a   :  { %s206_s8 = scalar_lea.vmem %s29_s27, 128  ;;  %p211_p12 = scmp.lt.s32.totalorder %s29_s27, %s29_s27 }
  0x1b   :  { %p207_p11 = scmp.ne.s32.totalorder %s29_s27, %s206_s8  ;;  %p212_p13 = scmp.lt.s32.totalorder %s206_s8, %s206_s8 }
  0x1d   :  { %p213_p0 = por %p212_p13, %p211_p12 }
  0x1f   :  { %p214_p1 = pnand %p213_p0, %p207_p11 }
  0x21   :  { %217 = shalt.err (!%p214_p1)
}
  0x22   :  { %s250_s0 = smov 64   ;;  %s251_s9 = smov 4  }
  0x23   :  { %34 = dma.hbm_to_vmem [thread:$0]  %s321_s1, 128, %s29_s27, [#allocation7], %s250_s0, %s250_s0, %s251_s9  }
  0x24   :  { %240 = dma.done.wait [#allocation4], 256  }
  0x25   :  { %241 = vsyncadd [#allocation4], 4294967040 }
  0x26   :  { %242 = dma.done.wait [#allocation7], 128  }
  0x27   :  { %243 = vsyncadd [#allocation7], 4294967168  ;;  %v252_v0 = vmov 0.0   ;;  %vm253_vm0 = vmmov 0   ;;  %v173_v1 = vld [vmem:[#allocation6] sm:$0xff]   ;;  %v50_v2 = vld [vmem:[#allocation3] sm:$0xff] }
  0x28   :  { %158 = vmatprep.subr.bf16.mxu0 %v252_v0  ;;  %160 = vmatprep.mubr.msk.bf16.mxu0 %vm253_vm0, %v252_v0  ;;  %v51_v3 = vld [vmem:[#allocation3 + $0x8] sm:$0xff]  ;;  %vm68_vm1 = vcmask 130048   ;;  %v155_v5 = vld [vmem:[%s322_s2] ss:$0 sm:$0xff]  ;;  %s254_s1 = smov [#allocation8]  }
  0x29   :  { %159 = vmatpush3.bf16.msra.mxu0 %v173_v1  ;;  %v52_v4 = vpack.c.bf16 %v51_v3, %v50_v2  ;;  %s138_s14 = sshll.u32 %s254_s1, 4  ;;  %s139_s14 = int_to_ptr.vmem [resolvable:$true] %s138_s14 }
  0x2a   :  { %s218_s15 = scalar_lea.vmem %s139_s14, 256  ;;  %p223_p3 = scmp.lt.s32.totalorder %s139_s14, %s139_s14 }
  0x2b   :  { %p219_p2 = scmp.ne.s32.totalorder %s139_s14, %s218_s15  ;;  %p224_p4 = scmp.lt.s32.totalorder %s218_s15, %s218_s15 }
  0x2c   :  { %161 = vmatmul.mubr.msk.bf16.vlgmr.msra.gmra.mrb[0].mxu0 %vm68_vm1, %v52_v4 }
  0x2d   :  { %p225_p5 = por %p224_p4, %p223_p3 }
  0x2f   :  { %p226_p6 = pnand %p225_p5, %p219_p2 }
  0xff   :  { %v106_v6 = vpop.f32.mrb[0].mxu0 }
 0x100   :  { %v129_v7 = vadd.f32 %v155_v5, %v106_v6  ;;  %v162_v8 = vpop.f32.mrb[1].mxu0 }
 0x101   :  { %v109_v9 = vpop.f32.mrb[2].mxu0 }
 0x102   :  { %131 = vst [vmem:[#allocation8] sm:$0xff] %v129_v7  ;;  %v130_v10 = vadd.f32 %v155_v5, %v109_v9  ;;  %v163_v11 = vpop.f32.mrb[3].mxu0 }
 0x104   :  { %132 = vst [vmem:[#allocation8 + $0x8] sm:$0xff] %v130_v10 }
 0x105   :  { %229 = shalt.err (!%p226_p6)
}
 0x106   :  { %s230_s17 = scalar_lea.hbm %s323_s3, 256 }
 0x107   :  { %p231_p7 = scmp.ne.s32.totalorder %s323_s3, %s230_s17  ;;  %p234_p8 = scmp.lt.u32.totalorder %s230_s17, %s323_s3 }
 0x109   :  { %p236_p9 = pnand %p234_p8, %p231_p7 }
 0x10b   :  { %239 = shalt.err (!%p236_p9)
}
 0x10c   :  { %144 = dma.vmem_to_hbm [thread:$0]  %s139_s14, 256, %s323_s3, [#allocation5], %s247_s22, %s247_s22, %s248_s23  }
 0x10d   :  { %244 = dma.done.wait [#allocation5], 256  }
 0x10e   :  { %245 = vsyncadd [#allocation5], 4294967040 }
 0x10f   :  { %148 = vsyncpa [#allocation4], 1 }
 0x110   :  { %149 = vsyncpa [#allocation7], 1 }
 0x111   :  { %150 = vsyncpa [#allocation5], 1 }

</bundles_post_ra>
